<compile_context>
chip_gen: v7x
topology: tpu7x:2x2x1
jax: 0.10.0
libtpu: 0.0.40
codegen_flags: <defaults>
</compile_context>

<pallas_src>
import math

import jax
import jax.numpy as jnp
from jax.experimental import pallas as pl
from jax.experimental.pallas import tpu as pltpu

LANE = 128
SUBLANE = 8
_N_CHUNK = 512            # per-layer output-column chunk (caps f32 temporaries)


def _round_up(x, m):
    return ((x + m - 1) // m) * m


def _fused_linear_l_kernel(x_ref, *refs):
    """Fused LinearL stack: per layer  act = relu(act @ W' + shift).

    x_ref:  (tb, In0_pad)  f32  VMEM (batch tile)
    refs:   [w0, shift0, w1, shift1, ..., o_ref]
            w_i:     (Ini_pad, Outi_pad) bf16   (BN scale already folded in)
            shift_i: (1, Outi_pad)       f32    beta - mean*scale + bias*scale
    o_ref:  (tb, OutL_pad) f32  VMEM
    """
    o_ref = refs[-1]
    layer_refs = refs[:-1]
    num_layers = len(layer_refs) // 2

    act = x_ref[...]                                # f32 input activation
    for i in range(num_layers):                     # static unroll over layers
        w_ref = layer_refs[2 * i]
        shift_ref = layer_refs[2 * i + 1]
        out_pad = w_ref.shape[1]
        last = i == num_layers - 1
        a = act.astype(w_ref.dtype)                 # bf16 (no-op after layer 0)

        if out_pad <= _N_CHUNK:
            z = jnp.dot(a, w_ref[...], preferred_element_type=jnp.float32)
            z = jnp.maximum(z + shift_ref[...], 0.0)   # folded bias+BN, ReLU; dropout=id
            if last:
                o_ref[...] = z.astype(o_ref.dtype)
            else:
                act = z.astype(jnp.bfloat16)        # bf16 between layers
        else:
            # Chunk output columns: peak f32 temp is (tb, _N_CHUNK), stores stay
            # lane-dense (512-wide).  (Not triggered at toy sizes.)
            chunks = []
            for c0 in range(0, out_pad, _N_CHUNK):
                zc = jnp.dot(a, w_ref[:, c0:c0 + _N_CHUNK],
                             preferred_element_type=jnp.float32)
                zc = jnp.maximum(zc + shift_ref[:, c0:c0 + _N_CHUNK], 0.0)
                if last:
                    o_ref[:, c0:c0 + _N_CHUNK] = zc.astype(o_ref.dtype)
                else:
                    chunks.append(zc.astype(jnp.bfloat16))
            if not last:
                act = jnp.concatenate(chunks, axis=-1)


def _pick_batch_tile(B, batch_tile):
    """MXU-aligned batch tile; prefers >=2 grid steps when the batch allows."""
    batch_tile = max(LANE, _round_up(batch_tile, LANE))
    tb = min(batch_tile, _round_up(B, SUBLANE))
    if tb >= LANE:
        tb = min(_round_up(tb, LANE), batch_tile)
    # v7x: with a single grid step one TensorCore idles under ("parallel",).
    if _round_up(B, tb) // tb == 1 and tb % 256 == 0 and B > tb // 2:
        tb //= 2
    return tb


def linear_l_forward(x, params, *, batch_tile=512):
    """Run the whole LinearL stack in one pallas_call.

    params: list of (w_pad bf16 (In_pad, Out_pad) with BN scale folded in,
                     shift (1, Out_pad) f32) — already lane-padded.
    Returns padded output (B_pad, Out_pad_last); caller slices to (B, Out_last).
    """
    B, in_f0 = x.shape
    In_pad0 = params[0][0].shape[0]
    Out_pad_last = params[-1][0].shape[1]

    tb = _pick_batch_tile(B, batch_tile)
    B_pad = _round_up(B, tb)
    grid = (B_pad // tb,)

    # Avoid the host-side pad copy when shapes already line up.
    if B_pad == B and In_pad0 == in_f0:
        x_in = x
    else:
        x_in = jnp.zeros((B_pad, In_pad0), x.dtype).at[:B, :in_f0].set(x)

    in_specs = [pl.BlockSpec((tb, In_pad0), lambda b: (b, 0))]
    args = [x_in]
    flops = 0
    bytes_accessed = B_pad * In_pad0 * 4
    weight_bytes = 0
    max_out_pad = 0
    for (w, shift) in params:
        in_f, out_f = w.shape
        max_out_pad = max(max_out_pad, out_f)
        # Grid-invariant operands: single-buffered, stay VMEM-resident.
        in_specs.append(pl.BlockSpec((in_f, out_f), lambda b: (0, 0),
                                     pipeline_mode=pl.Buffered(1)))
        in_specs.append(pl.BlockSpec((1, out_f), lambda b: (0, 0),
                                     pipeline_mode=pl.Buffered(1)))
        args += [w, shift]
        flops += 2 * B_pad * in_f * out_f
        weight_bytes += in_f * out_f * 2 + out_f * 4
        bytes_accessed += in_f * out_f * 2 + out_f * 4
    bytes_accessed += B_pad * Out_pad_last * 4

    # Explicit VMEM budget: resident weights (x1) + double-buffered x/out tiles
    # + f32 z chunk + bf16 activation carry.  Floor 32 MiB, cap 56 MiB so the
    # same setting is safe on v5e/v6e (128 MiB) and v7x (64 MiB/TC).
    tile_bytes = 2 * tb * In_pad0 * 4 + 2 * tb * Out_pad_last * 4
    temp_bytes = tb * min(max_out_pad, _N_CHUNK) * 4 + tb * max_out_pad * 2
    need = weight_bytes + tile_bytes + temp_bytes
    vmem_limit = int(min(max(need * 5 // 4 + (4 << 20), 32 << 20), 56 << 20))

    return pl.pallas_call(
        _fused_linear_l_kernel,
        out_shape=jax.ShapeDtypeStruct((B_pad, Out_pad_last), x.dtype),
        grid=grid,
        in_specs=in_specs,
        out_specs=pl.BlockSpec((tb, Out_pad_last), lambda b: (b, 0)),
        compiler_params=pltpu.CompilerParams(
            dimension_semantics=("parallel",),   # batch axis: shards across TCs on v7x
            vmem_limit_bytes=vmem_limit,
        ),
        cost_estimate=pl.CostEstimate(
            flops=flops, transcendentals=0, bytes_accessed=bytes_accessed),
    )(*args)


def init_linear_l_params(key, layers_hidden, eps=1e-5, param_dtype=jnp.bfloat16):
    """Params mirroring nn.Linear + BatchNorm1d (eval), fully folded, lane-padded.

    Folds:  scale = gamma / sqrt(var + eps)
            W'    = (W * scale)  (in f32, then one bf16 cast)
            shift = beta - mean*scale + bias*scale
    Returns (padded kernel params, unpadded reference params).
    """
    params = []
    ref_params = []
    for in_f, out_f in zip(layers_hidden, layers_hidden[1:]):
        key, kw, kb, kg, kbe, km, kv = jax.random.split(key, 7)
        bound = 1.0 / math.sqrt(in_f)
        # PyTorch nn.Linear: weight (out_f, in_f) ~ U(-bound, bound); stored transposed.
        w = jax.random.uniform(kw, (in_f, out_f), jnp.float32, -bound, bound)
        b = jax.random.uniform(kb, (1, out_f), jnp.float32, -bound, bound)
        # Randomized BatchNorm1d params / running stats (eval mode).
        gamma = jax.random.uniform(kg, (1, out_f), jnp.float32, 0.5, 1.5)
        beta = jax.random.normal(kbe, (1, out_f), jnp.float32) * 0.1
        running_mean = jax.random.normal(km, (1, out_f), jnp.float32) * 0.1
        running_var = jax.random.uniform(kv, (1, out_f), jnp.float32, 0.5, 1.5)

        scale = gamma / jnp.sqrt(running_var + eps)
        shift = beta - running_mean * scale + b * scale
        # Exact fold of BN scale into W, done in f32 before the single bf16 cast.
        w_folded = (w * scale).astype(param_dtype)

        # Zero-pad feature dims to multiples of 128 lanes.
        in_pad = _round_up(in_f, LANE)
        out_pad = _round_up(out_f, LANE)
        w_pad = (jnp.zeros((in_pad, out_pad), param_dtype)
                 .at[:in_f, :out_f].set(w_folded))
        shift_pad = jnp.zeros((1, out_pad), jnp.float32).at[:, :out_f].set(shift)

        params.append((w_pad, shift_pad))
        ref_params.append((w_folded, shift))
    return params, ref_params


def linear_l_reference(x, ref_params):
    """Pure-JAX reference with identical math (bf16 matmul, f32 epilogue,
    bf16 activations between layers, f32 final output)."""
    act = x
    n = len(ref_params)
    for i, (w_bf16, shift) in enumerate(ref_params):
        z = jnp.dot(act.astype(w_bf16.dtype), w_bf16,
                    preferred_element_type=jnp.float32)
        z = jnp.maximum(z + shift, 0.0)
        act = z if i == n - 1 else z.astype(jnp.bfloat16)
    return act


if __name__ == "__main__":
    layers_hidden = [32, 64, 16]   # two LinearLayer blocks: 32->64, 64->16
    batch = 8

    key = jax.random.PRNGKey(0)
    kx, kp = jax.random.split(key)
    x = jax.random.normal(kx, (batch, layers_hidden[0]), jnp.float32)
    params, ref_params = init_linear_l_params(kp, layers_hidden)

    out_features = layers_hidden[-1]
    fwd = jax.jit(lambda x, p: linear_l_forward(x, p)[:batch, :out_features])
    out = jax.block_until_ready(fwd(x, params))

    ref = linear_l_reference(x, ref_params)
    assert out.shape == (batch, out_features)
    assert jnp.allclose(out, ref, atol=1e-2, rtol=1e-2), float(
        jnp.max(jnp.abs(out - ref)))

    print("KERNEL_OK")
</pallas_src>

<mosaic_0001>
module attributes {stable_mosaic.version = 11 : i64} {
  func.func @_fused_linear_l_kernel(%arg0: i32, %arg1: memref<8x128xf32, #tpu.memory_space<vmem>>, %arg2: memref<128x128xbf16, #tpu.memory_space<vmem>>, %arg3: memref<1x128xf32, #tpu.memory_space<vmem>>, %arg4: memref<128x128xbf16, #tpu.memory_space<vmem>>, %arg5: memref<1x128xf32, #tpu.memory_space<vmem>>, %arg6: memref<8x128xf32, #tpu.memory_space<vmem>>) attributes {dimension_semantics = [#tpu.dimension_semantics<parallel>], iteration_bounds = array<i64: 1>, scalar_prefetch = 0 : i64, scratch_operands = 0 : i64, tpu.core_type = #tpu.core_type<tc>, window_params = [{transform_indices = @transform_0, window_bounds = array<i64: 8, 128>}, {pipeline_mode = #tpu.pipeline_mode<synchronous>, transform_indices = @transform_1, window_bounds = array<i64: 128, 128>}, {pipeline_mode = #tpu.pipeline_mode<synchronous>, transform_indices = @transform_2, window_bounds = array<i64: 1, 128>}, {pipeline_mode = #tpu.pipeline_mode<synchronous>, transform_indices = @transform_3, window_bounds = array<i64: 128, 128>}, {pipeline_mode = #tpu.pipeline_mode<synchronous>, transform_indices = @transform_4, window_bounds = array<i64: 1, 128>}, {transform_indices = @transform_5, window_bounds = array<i64: 8, 128>}]} {
    %c0 = arith.constant 0 : index
    %c0_0 = arith.constant 0 : index
    %0 = vector.load %arg1[%c0, %c0_0] : memref<8x128xf32, #tpu.memory_space<vmem>>, vector<8x128xf32>
    %1 = arith.truncf %0 : vector<8x128xf32> to vector<8x128xbf16>
    %c0_1 = arith.constant 0 : index
    %c0_2 = arith.constant 0 : index
    %2 = vector.load %arg2[%c0_1, %c0_2] : memref<128x128xbf16, #tpu.memory_space<vmem>>, vector<128x128xbf16>
    %cst = arith.constant dense<0.000000e+00> : vector<8x128xf32>
    %3 = tpu.matmul %1, %2, %cst {dimension_numbers = #tpu.dot_dimension_numbers<[1], [0], [0], [1], [0, 0, 1, 1], [], []>} : vector<8x128xbf16>, vector<128x128xbf16>, vector<8x128xf32> -> vector<8x128xf32>
    %c0_3 = arith.constant 0 : index
    %c0_4 = arith.constant 0 : index
    %4 = vector.load %arg3[%c0_3, %c0_4] : memref<1x128xf32, #tpu.memory_space<vmem>>, vector<1x128xf32>
    %5 = vector.broadcast %4 : vector<1x128xf32> to vector<8x128xf32>
    %6 = arith.addf %3, %5 : vector<8x128xf32>
    %cst_5 = arith.constant 0.000000e+00 : f32
    %7 = vector.broadcast %cst_5 : f32 to vector<8x128xf32>
    %8 = arith.maximumf %6, %7 : vector<8x128xf32>
    %9 = arith.truncf %8 : vector<8x128xf32> to vector<8x128xbf16>
    %c0_6 = arith.constant 0 : index
    %c0_7 = arith.constant 0 : index
    %10 = vector.load %arg4[%c0_6, %c0_7] : memref<128x128xbf16, #tpu.memory_space<vmem>>, vector<128x128xbf16>
    %cst_8 = arith.constant dense<0.000000e+00> : vector<8x128xf32>
    %11 = tpu.matmul %9, %10, %cst_8 {dimension_numbers = #tpu.dot_dimension_numbers<[1], [0], [0], [1], [0, 0, 1, 1], [], []>} : vector<8x128xbf16>, vector<128x128xbf16>, vector<8x128xf32> -> vector<8x128xf32>
    %c0_9 = arith.constant 0 : index
    %c0_10 = arith.constant 0 : index
    %12 = vector.load %arg5[%c0_9, %c0_10] : memref<1x128xf32, #tpu.memory_space<vmem>>, vector<1x128xf32>
    %13 = vector.broadcast %12 : vector<1x128xf32> to vector<8x128xf32>
    %14 = arith.addf %11, %13 : vector<8x128xf32>
    %cst_11 = arith.constant 0.000000e+00 : f32
    %15 = vector.broadcast %cst_11 : f32 to vector<8x128xf32>
    %16 = arith.maximumf %14, %15 : vector<8x128xf32>
    %c0_12 = arith.constant 0 : index
    %c0_13 = arith.constant 0 : index
    %17 = vector.load %arg6[%c0_12, %c0_13] : memref<8x128xf32, #tpu.memory_space<vmem>>, vector<8x128xf32>
    tpu.vector_store %arg6[%c0_12, %c0_13], %16 {strides = array<i32>} : memref<8x128xf32, #tpu.memory_space<vmem>>, vector<8x128xf32>,
    return
  }
  func.func @transform_0(%arg0: i32) -> (i32, i32) {
    %c0_i32 = arith.constant 0 : i32
    %c0_i32_0 = arith.constant 0 : i32
    return %arg0, %c0_i32 : i32, i32
  }
  func.func @transform_1(%arg0: i32) -> (i32, i32) {
    %c0_i32 = arith.constant 0 : i32
    %c0_i32_0 = arith.constant 0 : i32
    %c0_i32_1 = arith.constant 0 : i32
    return %c0_i32, %c0_i32_0 : i32, i32
  }
  func.func @transform_2(%arg0: i32) -> (i32, i32) {
    %c0_i32 = arith.constant 0 : i32
    %c0_i32_0 = arith.constant 0 : i32
    %c0_i32_1 = arith.constant 0 : i32
    return %c0_i32, %c0_i32_0 : i32, i32
  }
  func.func @transform_3(%arg0: i32) -> (i32, i32) {
    %c0_i32 = arith.constant 0 : i32
    %c0_i32_0 = arith.constant 0 : i32
    %c0_i32_1 = arith.constant 0 : i32
    return %c0_i32, %c0_i32_0 : i32, i32
  }
  func.func @transform_4(%arg0: i32) -> (i32, i32) {
    %c0_i32 = arith.constant 0 : i32
    %c0_i32_0 = arith.constant 0 : i32
    %c0_i32_1 = arith.constant 0 : i32
    return %c0_i32, %c0_i32_0 : i32, i32
  }
  func.func @transform_5(%arg0: i32) -> (i32, i32) {
    %c0_i32 = arith.constant 0 : i32
    %c0_i32_0 = arith.constant 0 : i32
    return %arg0, %c0_i32 : i32, i32
  }
}

</mosaic_0001>

<bundles_post_ra>
// kernel: _lambda_.1
= control target key start
LH: loop header
LB: loop body
LE: loop exit
PB: predicated region body
PF: predicated region fallthrough
CT: control target
= control target key end

     0   :  { %10 = vsyncpa [#allocation3], 0  ;;  %s547_s0 = inlined_call_operand.vmem [shape: f32[8,128], index: 0, kind: input, shape index: {}]   ;;  %s548_s1 = inlined_call_operand.hbm [shape: bf16[128,128], index: 1, kind: input, shape index: {}]   ;;  %s549_s2 = inlined_call_operand.vmem [shape: f32[1,128], index: 2, kind: input, shape index: {}]   ;;  %s550_s3 = inlined_call_operand.hbm [shape: bf16[128,128], index: 3, kind: input, shape index: {}]   ;;  %s551_s4 = inlined_call_operand.vmem [shape: f32[1,128], index: 4, kind: input, shape index: {}]   ;;  %s552_s5 = inlined_call_operand.hbm [shape: f32[8,128], index: 5, kind: output, shape index: {}]  }
   0x1   :  { %11 = vsyncpa [#allocation6], 0 }
   0x2   :  { %12 = vsyncpa [#allocation4], 0  ;;  %s465_s18 = smov [#allocation2]   ;;  %s393_s22 = scalar_lea.hbm %s548_s1, 1024 }
   0x3   :  { %s20_s19 = sshll.u32 %s465_s18, 4  ;;  %p394_p0 = scmp.ne.s32.totalorder %s548_s1, %s393_s22  ;;  %s21_s19 = int_to_ptr.vmem [resolvable:$true] %s20_s19 }
   0x4   :  { %p397_p1 = scmp.lt.u32.totalorder %s393_s22, %s548_s1 }
   0x6   :  { %p399_p2 = pnand %p397_p1, %p394_p0 }
   0x8   :  { %402 = shalt.err (!%p399_p2)
}
   0x9   :  { %s403_s27 = scalar_lea.vmem %s21_s19, 1024  ;;  %p408_p4 = scmp.lt.s32.totalorder %s21_s19, %s21_s19 }
   0xa   :  { %p404_p3 = scmp.ne.s32.totalorder %s21_s19, %s403_s27  ;;  %p409_p5 = scmp.lt.s32.totalorder %s403_s27, %s403_s27 }
   0xc   :  { %p410_p6 = por %p409_p5, %p408_p4 }
   0xe   :  { %p411_p7 = pnand %p410_p6, %p404_p3 }
  0x10   :  { %414 = shalt.err (!%p411_p7)
}
  0x11   :  { %s466_s28 = smov 64   ;;  %s467_s29 = smov 4  }
  0x12   :  { %26 = dma.hbm_to_vmem [thread:$0]  %s548_s1, 1024, %s21_s19, [#allocation3], %s466_s28, %s466_s28, %s467_s29  }
  0x13   :  { %s468_s7 = smov [#allocation5]   ;;  %s415_s11 = scalar_lea.hbm %s550_s3, 1024 }
  0x14   :  { %s34_s8 = sshll.u32 %s468_s7, 4  ;;  %p416_p8 = scmp.ne.s32.totalorder %s550_s3, %s415_s11  ;;  %s35_s8 = int_to_ptr.vmem [resolvable:$true] %s34_s8 }
  0x15   :  { %p419_p9 = scmp.lt.u32.totalorder %s415_s11, %s550_s3 }
  0x17   :  { %p421_p10 = pnand %p419_p9, %p416_p8 }
  0x19   :  { %424 = shalt.err (!%p421_p10)
}
  0x1a   :  { %s425_s16 = scalar_lea.vmem %s35_s8, 1024  ;;  %p430_p12 = scmp.lt.s32.totalorder %s35_s8, %s35_s8 }
  0x1b   :  { %p426_p11 = scmp.ne.s32.totalorder %s35_s8, %s425_s16  ;;  %p431_p13 = scmp.lt.s32.totalorder %s425_s16, %s425_s16 }
  0x1d   :  { %p432_p0 = por %p431_p13, %p430_p12 }
  0x1f   :  { %p433_p1 = pnand %p432_p0, %p426_p11 }
  0x21   :  { %436 = shalt.err (!%p433_p1)
}
  0x22   :  { %40 = dma.hbm_to_vmem [thread:$0]  %s550_s3, 1024, %s35_s8, [#allocation6], %s466_s28, %s466_s28, %s467_s29  }
  0x23   :  { %459 = dma.done.wait [#allocation3], 1024  }
  0x24   :  { %460 = vsyncadd [#allocation3], 4294966272 }
  0x25   :  { %461 = dma.done.wait [#allocation6], 1024  }
  0x26   :  { %462 = vsyncadd [#allocation6], 4294966272  ;;  %v469_v0 = vmov 0.0   ;;  %vm470_vm0 = vmmov 0   ;;  %v377_v1 = vld [vmem:[#allocation2] sm:$0xff]   ;;  %v378_v2 = vld [vmem:[#allocation2 + $0x8] sm:$0xff]  }
  0x27   :  { %330 = vmatprep.subr.bf16.mxu0 %v469_v0  ;;  %346 = vmatprep.mubr.msk.bf16.mxu0 %vm470_vm0, %v469_v0  ;;  %v379_v3 = vld [vmem:[#allocation2 + $0x10] sm:$0xff]   ;;  %v385_v4 = vld [vmem:[#allocation5] sm:$0xff]   ;;  %v380_v5 = vld [vmem:[#allocation2 + $0x18] sm:$0xff]   ;;  %s471_s22 = smov [#allocation7]  }
  0x28   :  { %350 = vmatprep.subr.bf16.mxu1 %v469_v0  ;;  %366 = vmatprep.mubr.msk.bf16.mxu1 %vm470_vm0, %v469_v0  ;;  %v386_v6 = vld [vmem:[#allocation5 + $0x8] sm:$0xff]   ;;  %v381_v7 = vld [vmem:[#allocation2 + $0x20] sm:$0xff]   ;;  %v387_v8 = vld [vmem:[#allocation5 + $0x10] sm:$0xff]   ;;  %s284_s23 = sshll.u32 %s471_s22, 4  ;;  %s285_s23 = int_to_ptr.vmem [resolvable:$true] %s284_s23 }
  0x29   :  { %331 = vmatpush3.bf16.msra.mxu0 %v377_v1  ;;  %351 = vmatpush3.bf16.msra.mxu1 %v385_v4  ;;  %v382_v9 = vld [vmem:[#allocation2 + $0x28] sm:$0xff]   ;;  %v388_v10 = vld [vmem:[#allocation5 + $0x18] sm:$0xff]   ;;  %v383_v11 = vld [vmem:[#allocation2 + $0x30] sm:$0xff]   ;;  %p442_p3 = scmp.lt.s32.totalorder %s285_s23, %s285_s23 }
  0x2a   :  { %332 = vmatprep.subr.bf16.mxu0 %v469_v0  ;;  %352 = vmatprep.subr.bf16.mxu1 %v469_v0  ;;  %v389_v12 = vld [vmem:[#allocation5 + $0x20] sm:$0xff]   ;;  %v384_v13 = vld [vmem:[#allocation2 + $0x38] sm:$0xff]   ;;  %v390_v15 = vld [vmem:[#allocation5 + $0x28] sm:$0xff]  }
  0x2b   :  { %v50_v14 = vld [vmem:[%s547_s0] sm:$0xff]  ;;  %v391_v17 = vld [vmem:[#allocation5 + $0x30] sm:$0xff]   ;;  %v392_v18 = vld [vmem:[#allocation5 + $0x38] sm:$0xff]  }
  0x2c   :  { %v51_v16 = vpack.c.bf16 %v50_v14, %v50_v14  ;;  %v294_v19 = vld [vmem:[%s549_s2] ss:$0 sm:$0xff]  ;;  %s437_s2 = scalar_lea.vmem %s285_s23, 128 }
  0x2d   :  { %333 = vmatpush3.bf16.msra.mxu0 %v378_v2  ;;  %353 = vmatpush3.bf16.msra.mxu1 %v386_v6  ;;  %v303_v27 = vld [vmem:[%s551_s4] ss:$0 sm:$0xff]  ;;  %p438_p2 = scmp.ne.s32.totalorder %s285_s23, %s437_s2  ;;  %p443_p4 = scmp.lt.s32.totalorder %s437_s2, %s437_s2 }
  0x2e   :  { %334 = vmatprep.subr.bf16.mxu0 %v469_v0  ;;  %354 = vmatprep.subr.bf16.mxu1 %v469_v0 }
  0x2f   :  { %p444_p5 = por %p443_p4, %p442_p3 }
  0x31   :  { %335 = vmatpush3.bf16.msra.mxu0 %v379_v3  ;;  %355 = vmatpush3.bf16.msra.mxu1 %v387_v8  ;;  %p445_p6 = pnand %p444_p5, %p438_p2 }
  0x32   :  { %336 = vmatprep.subr.bf16.mxu0 %v469_v0  ;;  %356 = vmatprep.subr.bf16.mxu1 %v469_v0 }
  0x35   :  { %337 = vmatpush3.bf16.msra.mxu0 %v380_v5  ;;  %357 = vmatpush3.bf16.msra.mxu1 %v388_v10 }
  0x36   :  { %338 = vmatprep.subr.bf16.mxu0 %v469_v0  ;;  %358 = vmatprep.subr.bf16.mxu1 %v469_v0 }
  0x39   :  { %339 = vmatpush3.bf16.msra.mxu0 %v381_v7  ;;  %359 = vmatpush3.bf16.msra.mxu1 %v389_v12 }
  0x3a   :  { %340 = vmatprep.subr.bf16.mxu0 %v469_v0  ;;  %360 = vmatprep.subr.bf16.mxu1 %v469_v0 }
  0x3d   :  { %341 = vmatpush3.bf16.msra.mxu0 %v382_v9  ;;  %361 = vmatpush3.bf16.msra.mxu1 %v390_v15 }
  0x3e   :  { %342 = vmatprep.subr.bf16.mxu0 %v469_v0  ;;  %362 = vmatprep.subr.bf16.mxu1 %v469_v0 }
  0x41   :  { %343 = vmatpush3.bf16.msra.mxu0 %v383_v11  ;;  %363 = vmatpush3.bf16.msra.mxu1 %v391_v17 }
  0x42   :  { %344 = vmatprep.subr.bf16.mxu0 %v469_v0  ;;  %364 = vmatprep.subr.bf16.mxu1 %v469_v0 }
  0x45   :  { %345 = vmatpush3.bf16.msra.mxu0 %v384_v13  ;;  %365 = vmatpush3.bf16.msra.mxu1 %v392_v18 }
  0x48   :  { %347 = vmatmul.mubr.bf16.vlgmr.msra.gmra.mrb[0].mxu0 %v51_v16 }
 0x11b   :  { %v157_v20 = vpop.f32.mrb[0].mxu0 }
 0x11c   :  { %v158_v21 = vadd.f32 %v294_v19, %v157_v20  ;;  %v348_v22 = vpop.f32.mrb[1].mxu0 }
 0x11d   :  { %v160_v23 = vpop.f32.mrb[2].mxu0 }
 0x11e   :  { %v163_v24 = vmax.f32 %v158_v21, 0.0  ;;  %v349_v25 = vpop.f32.mrb[3].mxu0 }
 0x120   :  { %v164_v26 = vpack.c.bf16 %v163_v24, %v163_v24 }
 0x122   :  { %367 = vmatmul.mubr.bf16.vlgmr.msra.gmra.mrb[0].mxu1 %v164_v26 }
 0x1f5   :  { %v270_v28 = vpop.f32.mrb[0].mxu1 }
 0x1f6   :  { %v271_v29 = vadd.f32 %v303_v27, %v270_v28  ;;  %v368_v30 = vpop.f32.mrb[1].mxu1 }
 0x1f7   :  { %v273_v31 = vpop.f32.mrb[2].mxu1 }
 0x1f8   :  { %v276_v32 = vmax.f32 %v271_v29, 0.0  ;;  %v369_v33 = vpop.f32.mrb[3].mxu1 }
 0x1fa   :  { %277 = vst [vmem:[#allocation7] sm:$0xff] %v276_v32 }
 0x1fb   :  { %448 = shalt.err (!%p445_p6)
}
 0x1fc   :  { %s449_s4 = scalar_lea.hbm %s552_s5, 128 }
 0x1fd   :  { %p450_p7 = scmp.ne.s32.totalorder %s552_s5, %s449_s4  ;;  %p453_p8 = scmp.lt.u32.totalorder %s449_s4, %s552_s5 }
 0x1ff   :  { %p455_p9 = pnand %p453_p8, %p450_p7 }
 0x201   :  { %458 = shalt.err (!%p455_p9)
}
 0x202   :  { %287 = dma.vmem_to_hbm [thread:$0]  %s285_s23, 128, %s552_s5, [#allocation4]  }
 0x203   :  { %463 = dma.done.wait [#allocation4], 128  }
 0x204   :  { %464 = vsyncadd [#allocation4], 4294967168 }
 0x205   :  { %291 = vsyncpa [#allocation3], 1 }
 0x206   :  { %292 = vsyncpa [#allocation6], 1 }
 0x207   :  { %293 = vsyncpa [#allocation4], 1 }

</bundles_post_ra>
